<compile_context>
chip_gen: v6e
topology: v6e:2x2x1
jax: 0.10.0
libtpu: 0.0.40
codegen_flags: <defaults>
</compile_context>

<pallas_src>
import functools

import jax
import jax.numpy as jnp
from jax.experimental import pallas as pl
from jax.experimental.pallas import tpu as pltpu


def _round_up(x, m):
    return ((x + m - 1) // m) * m


def _combine_kernel(x_ref, wb_ref, cb_ref, wpool_ref, bcat_ref, out_ref, srows_ref,
                    *, nb, hp2, h):
    """One grid step processes NB images.

    x_ref     : (NB*(H+2), (W+2)*C_in) bf16  zero-padded images, rows flattened per image
    wb_ref    : (3, (W+2)*C_in, W*C_out) bf16  banded conv weight, one slab per kh shift
    cb_ref    : (1, W*C_out)  f32  conv bias tiled over w
    wpool_ref : (W*C_out, 128) bf16  fused (mean over h,w)/(H*W) + [articleType|baseColour]
    bcat_ref  : (1, 128)      f32  fused head bias (lane padded)
    out_ref   : (NB, 128)     f32  fused logits slab
    srows_ref : (NB, W*C_out) f32  scratch: per-image sum over H of relu(conv)
    """
    r_total = nb * hp2

    # Conv2d(3x3, pad=1): three shifted K=72 MXU matmuls.  The h-shift is a row offset on
    # the flattened image rows; the w-shift and width zero-padding are baked into the
    # banded weight slabs.  bf16 inputs, f32 accumulation.
    conv = jnp.dot(x_ref[pl.ds(0, r_total - 2), :], wb_ref[0],
                   preferred_element_type=jnp.float32)
    conv += jnp.dot(x_ref[pl.ds(1, r_total - 2), :], wb_ref[1],
                    preferred_element_type=jnp.float32)
    conv += jnp.dot(x_ref[pl.ds(2, r_total - 2), :], wb_ref[2],
                    preferred_element_type=jnp.float32)
    conv = jnp.maximum(conv + cb_ref[...], 0.0)        # (R-2, W*C_out): bias + ReLU

    # AdaptiveAvgPool2d(1) over H: per-image sublane sum of the H valid conv rows.
    # (Rows i*hp2+H .. i*hp2+H+1 are inter-image wrap garbage and are never read.)
    for i in range(nb):
        srows_ref[pl.ds(i, 1), :] = jnp.sum(conv[i * hp2:i * hp2 + h, :],
                                            axis=0, keepdims=True)

    # Pool over W, the 1/(H*W) scale and both Linear heads are fused into wpool:
    # one lane-dense (NB, 512) @ (512, 128) matmul and one 128-wide store.
    out_ref[...] = (jnp.dot(srows_ref[...].astype(jnp.bfloat16), wpool_ref[...],
                            preferred_element_type=jnp.float32) + bcat_ref[...])


@jax.jit
def combine_model_forward(x_nchw, conv_w, conv_b, wa, ba, wc, bc):
    """Pallas implementation of CombineModel.forward (get_img_features=False path).

    x_nchw : (N, C_in, H, W) float32   (PyTorch NCHW convention)
    conv_w : (C_out, C_in, 3, 3), conv_b : (C_out,)
    wa     : (A, C_out), ba : (A,)      (PyTorch Linear convention: y = x @ W.T + b)
    wc     : (B, C_out), bc : (B,)
    returns (articleType_logits (N, A), baseColour_logits (N, B))
    """
    N, C_in, H, W = x_nchw.shape
    C_out = conv_w.shape[0]
    A = wa.shape[0]
    B = wc.shape[0]
    KH, KW = 3, 3
    Hp2 = H + 2
    WCI = (W + 2) * C_in          # 72  : padded-width * channels (one flattened image row)
    WCO = W * C_out               # 512 : width * conv channels (conv-output lane layout)
    HEAD = A + B
    H_pad = _round_up(HEAD, 128)  # lane-dense fused-head width

    # Image tile: 8 images/step when the batch allows (sublane-dense (8,128) output
    # stores; multiple "parallel" grid steps so both v7x TensorCores pipeline at real
    # batch sizes); otherwise a single step over the whole batch (optimal on single-TC
    # v5e/v6e at tiny N -- for N=2 this is exactly one grid step).
    NB = 8 if (N % 8 == 0) else N
    G = N // NB

    # ---- glue: NCHW -> zero-padded NHWC, flattened to (N*(H+2), (W+2)*C_in) bf16 ----
    x_nhwc = jnp.transpose(x_nchw, (0, 2, 3, 1))                    # (N, H, W, C_in)
    xp = jnp.pad(x_nhwc, ((0, 0), (1, 1), (1, 1), (0, 0)))          # (N, H+2, W+2, C_in)
    x_rows = xp.reshape(N * Hp2, WCI).astype(jnp.bfloat16)          # (N*(H+2), 72)

    # ---- glue: banded conv weight slabs (constants, tiny) ----
    # wb[kh][(w+kw)*C_in + ci, w*C_out + co] == conv_w[co, ci, kh, kw]
    w_kkic = jnp.transpose(conv_w, (2, 3, 1, 0))                    # (KH, KW, C_in, C_out)
    slabs = []
    for kh in range(KH):
        blk = w_kkic[kh].reshape(KW * C_in, C_out)                  # (12, C_out)
        cols = [jnp.pad(blk, ((w * C_in, (W - 1 - w) * C_in), (0, 0))) for w in range(W)]
        slabs.append(jnp.concatenate(cols, axis=1))                 # (WCI, WCO)
    wb = jnp.stack(slabs, axis=0).astype(jnp.bfloat16)              # (3, WCI, WCO)
    cb_tiled = jnp.tile(conv_b, W).reshape(1, WCO).astype(jnp.float32)

    # ---- glue: fused (mean over w)/(H*W) + [articleType | baseColour] head matrix ----
    wcat = jnp.concatenate([wa, wc], axis=0).T                      # (C_out, A+B)
    wpool = jnp.tile(wcat, (W, 1)) / float(H * W)                   # (WCO, A+B)
    wpool = jnp.pad(wpool, ((0, 0), (0, H_pad - HEAD))).astype(jnp.bfloat16)
    bcat = jnp.pad(jnp.concatenate([ba, bc]), (0, H_pad - HEAD)).reshape(1, H_pad)
    bcat = bcat.astype(jnp.float32)

    kernel = functools.partial(_combine_kernel, nb=NB, hp2=Hp2, h=H)

    out = pl.pallas_call(
        kernel,
        out_shape=jax.ShapeDtypeStruct((N, H_pad), jnp.float32),
        grid=(G,),
        in_specs=[
            pl.BlockSpec((NB * Hp2, WCI), lambda g: (g, 0)),        # image rows: one group/step
            pl.BlockSpec((KH, WCI, WCO), lambda g: (0, 0, 0)),      # banded conv weights
            pl.BlockSpec((1, WCO), lambda g: (0, 0)),               # conv bias (tiled over w)
            pl.BlockSpec((WCO, H_pad), lambda g: (0, 0)),           # fused pool+head weight
            pl.BlockSpec((1, H_pad), lambda g: (0, 0)),             # fused head bias
        ],
        out_specs=pl.BlockSpec((NB, H_pad), lambda g: (g, 0)),
        scratch_shapes=[pltpu.VMEM((NB, WCO), jnp.float32)],
        compiler_params=pltpu.CompilerParams(
            dimension_semantics=("parallel",),
        ),
    )(x_rows, wb, cb_tiled, wpool, bcat)

    logits = out
    return logits[:, :A], logits[:, A:HEAD]


def _reference_forward(x_nchw, conv_w, conv_b, wa, ba, wc, bc):
    """Pure-JAX reference mirroring the PyTorch forward (for numerical check)."""
    y = jax.lax.conv_general_dilated(
        x_nchw, conv_w, window_strides=(1, 1), padding=((1, 1), (1, 1)),
        dimension_numbers=("NCHW", "OIHW", "NCHW"))
    y = jnp.maximum(y + conv_b.reshape(1, -1, 1, 1), 0.0)
    feat = jnp.mean(y, axis=(2, 3))                  # AdaptiveAvgPool2d(1).flatten(1)
    return feat @ wa.T + ba, feat @ wc.T + bc


if __name__ == "__main__":
    # Small, deterministic problem sizes.
    N, C_in, H, W = 2, 4, 16, 16
    C_out = 32
    NUM_ARTICLE = 8
    NUM_COLOUR = 8

    key = jax.random.PRNGKey(0)
    keys = jax.random.split(key, 7)
    x = jax.random.normal(keys[0], (N, C_in, H, W), dtype=jnp.float32)
    conv_w = jax.random.normal(keys[1], (C_out, C_in, 3, 3), dtype=jnp.float32) * 0.1
    conv_b = jax.random.normal(keys[2], (C_out,), dtype=jnp.float32) * 0.1
    wa = jax.random.normal(keys[3], (NUM_ARTICLE, C_out), dtype=jnp.float32) * 0.1
    ba = jax.random.normal(keys[4], (NUM_ARTICLE,), dtype=jnp.float32) * 0.1
    wc = jax.random.normal(keys[5], (NUM_COLOUR, C_out), dtype=jnp.float32) * 0.1
    bc = jax.random.normal(keys[6], (NUM_COLOUR,), dtype=jnp.float32) * 0.1

    logits_a, logits_c = combine_model_forward(x, conv_w, conv_b, wa, ba, wc, bc)
    jax.block_until_ready((logits_a, logits_c))

    ref_a, ref_c = _reference_forward(x, conv_w, conv_b, wa, ba, wc, bc)
    assert logits_a.shape == (N, NUM_ARTICLE) and logits_c.shape == (N, NUM_COLOUR)
    # bf16 image / conv / head operands (f32 MXU accumulation) -> relaxed tolerance
    # vs the pure-f32 reference.  This is intentional (native MXU path on v6e/v7x).
    assert jnp.allclose(logits_a, ref_a, atol=2e-2, rtol=2e-2)
    assert jnp.allclose(logits_c, ref_c, atol=2e-2, rtol=2e-2)

    print("KERNEL_OK")
</pallas_src>

<mosaic_0001>
module attributes {stable_mosaic.version = 11 : i64} {
  func.func @_combine_kernel(%arg0: i32, %arg1: memref<36x72xbf16, #tpu.memory_space<vmem>>, %arg2: memref<3x72x512xbf16, #tpu.memory_space<vmem>>, %arg3: memref<1x512xf32, #tpu.memory_space<vmem>>, %arg4: memref<512x128xbf16, #tpu.memory_space<vmem>>, %arg5: memref<1x128xf32, #tpu.memory_space<vmem>>, %arg6: memref<2x128xf32, #tpu.memory_space<vmem>>, %arg7: memref<2x512xf32, #tpu.memory_space<vmem>>) attributes {dimension_semantics = [#tpu.dimension_semantics<parallel>], iteration_bounds = array<i64: 1>, scalar_prefetch = 0 : i64, scratch_operands = 1 : i64, tpu.core_type = #tpu.core_type<tc>, window_params = [{transform_indices = @transform_0, window_bounds = array<i64: 36, 72>}, {pipeline_mode = #tpu.pipeline_mode<synchronous>, transform_indices = @transform_1, window_bounds = array<i64: 3, 72, 512>}, {pipeline_mode = #tpu.pipeline_mode<synchronous>, transform_indices = @transform_2, window_bounds = array<i64: 1, 512>}, {pipeline_mode = #tpu.pipeline_mode<synchronous>, transform_indices = @transform_3, window_bounds = array<i64: 512, 128>}, {pipeline_mode = #tpu.pipeline_mode<synchronous>, transform_indices = @transform_4, window_bounds = array<i64: 1, 128>}, {transform_indices = @transform_5, window_bounds = array<i64: 2, 128>}]} {
    %c0 = arith.constant 0 : index
    %c0_0 = arith.constant 0 : index
    %0 = vector.load %arg1[%c0, %c0_0] : memref<36x72xbf16, #tpu.memory_space<vmem>>, vector<34x72xbf16>
    %c0_1 = arith.constant 0 : index
    %c0_2 = arith.constant 0 : index
    %c0_3 = arith.constant 0 : index
    %1 = vector.load %arg2[%c0_1, %c0_2, %c0_3] : memref<3x72x512xbf16, #tpu.memory_space<vmem>>, vector<1x72x512xbf16>
    %2 = vector.shape_cast %1 : vector<1x72x512xbf16> to vector<72x512xbf16>
    %cst = arith.constant dense<0.000000e+00> : vector<34x512xf32>
    %3 = tpu.matmul %0, %2, %cst {dimension_numbers = #tpu.dot_dimension_numbers<[1], [0], [0], [1], [0, 0, 1, 1], [], []>} : vector<34x72xbf16>, vector<72x512xbf16>, vector<34x512xf32> -> vector<34x512xf32>
    %c1 = arith.constant 1 : index
    %c0_4 = arith.constant 0 : index
    %4 = vector.load %arg1[%c1, %c0_4] : memref<36x72xbf16, #tpu.memory_space<vmem>>, vector<34x72xbf16>
    %c1_5 = arith.constant 1 : index
    %c0_6 = arith.constant 0 : index
    %c0_7 = arith.constant 0 : index
    %5 = vector.load %arg2[%c1_5, %c0_6, %c0_7] : memref<3x72x512xbf16, #tpu.memory_space<vmem>>, vector<1x72x512xbf16>
    %6 = vector.shape_cast %5 : vector<1x72x512xbf16> to vector<72x512xbf16>
    %cst_8 = arith.constant dense<0.000000e+00> : vector<34x512xf32>
    %7 = tpu.matmul %4, %6, %cst_8 {dimension_numbers = #tpu.dot_dimension_numbers<[1], [0], [0], [1], [0, 0, 1, 1], [], []>} : vector<34x72xbf16>, vector<72x512xbf16>, vector<34x512xf32> -> vector<34x512xf32>
    %8 = arith.addf %3, %7 : vector<34x512xf32>
    %c2 = arith.constant 2 : index
    %c0_9 = arith.constant 0 : index
    %9 = vector.load %arg1[%c2, %c0_9] : memref<36x72xbf16, #tpu.memory_space<vmem>>, vector<34x72xbf16>
    %c2_10 = arith.constant 2 : index
    %c0_11 = arith.constant 0 : index
    %c0_12 = arith.constant 0 : index
    %10 = vector.load %arg2[%c2_10, %c0_11, %c0_12] : memref<3x72x512xbf16, #tpu.memory_space<vmem>>, vector<1x72x512xbf16>
    %11 = vector.shape_cast %10 : vector<1x72x512xbf16> to vector<72x512xbf16>
    %cst_13 = arith.constant dense<0.000000e+00> : vector<34x512xf32>
    %12 = tpu.matmul %9, %11, %cst_13 {dimension_numbers = #tpu.dot_dimension_numbers<[1], [0], [0], [1], [0, 0, 1, 1], [], []>} : vector<34x72xbf16>, vector<72x512xbf16>, vector<34x512xf32> -> vector<34x512xf32>
    %13 = arith.addf %8, %12 : vector<34x512xf32>
    %c0_14 = arith.constant 0 : index
    %c0_15 = arith.constant 0 : index
    %14 = vector.load %arg3[%c0_14, %c0_15] : memref<1x512xf32, #tpu.memory_space<vmem>>, vector<1x512xf32>
    %15 = vector.broadcast %14 : vector<1x512xf32> to vector<34x512xf32>
    %16 = arith.addf %13, %15 : vector<34x512xf32>
    %cst_16 = arith.constant 0.000000e+00 : f32
    %17 = vector.broadcast %cst_16 : f32 to vector<34x512xf32>
    %18 = arith.maximumf %16, %17 : vector<34x512xf32>
    %19 = vector.extract_strided_slice %18 {offsets = [0, 0], sizes = [16, 512], strides = [1, 1]} : vector<34x512xf32> to vector<16x512xf32>
    %cst_17 = arith.constant dense<0.000000e+00> : vector<512xf32>
    %20 = vector.multi_reduction <add>, %19, %cst_17 [0] : vector<16x512xf32> to vector<512xf32>
    %21 = vector.shape_cast %20 : vector<512xf32> to vector<1x512xf32>
    %c0_18 = arith.constant 0 : index
    %c0_19 = arith.constant 0 : index
    %22 = vector.load %arg7[%c0_18, %c0_19] : memref<2x512xf32, #tpu.memory_space<vmem>>, vector<1x512xf32>
    tpu.vector_store %arg7[%c0_18, %c0_19], %21 {strides = array<i32>} : memref<2x512xf32, #tpu.memory_space<vmem>>, vector<1x512xf32>,
    %23 = vector.extract_strided_slice %18 {offsets = [18, 0], sizes = [16, 512], strides = [1, 1]} : vector<34x512xf32> to vector<16x512xf32>
    %cst_20 = arith.constant dense<0.000000e+00> : vector<512xf32>
    %24 = vector.multi_reduction <add>, %23, %cst_20 [0] : vector<16x512xf32> to vector<512xf32>
    %25 = vector.shape_cast %24 : vector<512xf32> to vector<1x512xf32>
    %c1_21 = arith.constant 1 : index
    %c0_22 = arith.constant 0 : index
    %26 = vector.load %arg7[%c1_21, %c0_22] : memref<2x512xf32, #tpu.memory_space<vmem>>, vector<1x512xf32>
    tpu.vector_store %arg7[%c1_21, %c0_22], %25 {strides = array<i32>} : memref<2x512xf32, #tpu.memory_space<vmem>>, vector<1x512xf32>,
    %c0_23 = arith.constant 0 : index
    %c0_24 = arith.constant 0 : index
    %27 = vector.load %arg7[%c0_23, %c0_24] : memref<2x512xf32, #tpu.memory_space<vmem>>, vector<2x512xf32>
    %28 = arith.truncf %27 : vector<2x512xf32> to vector<2x512xbf16>
    %c0_25 = arith.constant 0 : index
    %c0_26 = arith.constant 0 : index
    %29 = vector.load %arg4[%c0_25, %c0_26] : memref<512x128xbf16, #tpu.memory_space<vmem>>, vector<512x128xbf16>
    %cst_27 = arith.constant dense<0.000000e+00> : vector<2x128xf32>
    %30 = tpu.matmul %28, %29, %cst_27 {dimension_numbers = #tpu.dot_dimension_numbers<[1], [0], [0], [1], [0, 0, 1, 1], [], []>} : vector<2x512xbf16>, vector<512x128xbf16>, vector<2x128xf32> -> vector<2x128xf32>
    %c0_28 = arith.constant 0 : index
    %c0_29 = arith.constant 0 : index
    %31 = vector.load %arg5[%c0_28, %c0_29] : memref<1x128xf32, #tpu.memory_space<vmem>>, vector<1x128xf32>
    %32 = vector.broadcast %31 : vector<1x128xf32> to vector<2x128xf32>
    %33 = arith.addf %30, %32 : vector<2x128xf32>
    %c0_30 = arith.constant 0 : index
    %c0_31 = arith.constant 0 : index
    %34 = vector.load %arg6[%c0_30, %c0_31] : memref<2x128xf32, #tpu.memory_space<vmem>>, vector<2x128xf32>
    tpu.vector_store %arg6[%c0_30, %c0_31], %33 {strides = array<i32>} : memref<2x128xf32, #tpu.memory_space<vmem>>, vector<2x128xf32>,
    return
  }
  func.func @transform_0(%arg0: i32) -> (i32, i32) {
    %c0_i32 = arith.constant 0 : i32
    %c0_i32_0 = arith.constant 0 : i32
    return %arg0, %c0_i32 : i32, i32
  }
  func.func @transform_1(%arg0: i32) -> (i32, i32, i32) {
    %c0_i32 = arith.constant 0 : i32
    %c0_i32_0 = arith.constant 0 : i32
    %c0_i32_1 = arith.constant 0 : i32
    %c0_i32_2 = arith.constant 0 : i32
    return %c0_i32, %c0_i32_0, %c0_i32_1 : i32, i32, i32
  }
  func.func @transform_2(%arg0: i32) -> (i32, i32) {
    %c0_i32 = arith.constant 0 : i32
    %c0_i32_0 = arith.constant 0 : i32
    %c0_i32_1 = arith.constant 0 : i32
    return %c0_i32, %c0_i32_0 : i32, i32
  }
  func.func @transform_3(%arg0: i32) -> (i32, i32) {
    %c0_i32 = arith.constant 0 : i32
    %c0_i32_0 = arith.constant 0 : i32
    %c0_i32_1 = arith.constant 0 : i32
    return %c0_i32, %c0_i32_0 : i32, i32
  }
  func.func @transform_4(%arg0: i32) -> (i32, i32) {
    %c0_i32 = arith.constant 0 : i32
    %c0_i32_0 = arith.constant 0 : i32
    %c0_i32_1 = arith.constant 0 : i32
    return %c0_i32, %c0_i32_0 : i32, i32
  }
  func.func @transform_5(%arg0: i32) -> (i32, i32) {
    %c0_i32 = arith.constant 0 : i32
    %c0_i32_0 = arith.constant 0 : i32
    return %arg0, %c0_i32 : i32, i32
  }
}

</mosaic_0001>

<bundles_post_ra>
// kernel: tile.13
= control target key start
LH: loop header
LB: loop body
LE: loop exit
PB: predicated region body
PF: predicated region fallthrough
CT: control target
= control target key end

     0   :  { %s28_s0 = inlined_call_operand.vmem [shape: f32[32], index: 0, kind: input, shape index: {}]   ;;  %s29_s1 = inlined_call_operand.vmem [shape: f32[16,32], index: 1, kind: output, shape index: {}]  }
   0x1   :  { %v4_v0 = vld [vmem:[%s28_s0] ss:$0 sm:$0xff] }
   0x2   :  { %5 = vst [vmem:[%s29_s1] sm:$0xff] %v4_v0  ;;  %8 = vst [vmem:[%s29_s1 + $0x8] sm:$0xff] %v4_v0 }

// kernel: tile.14
= control target key start
LH: loop header
LB: loop body
LE: loop exit
PB: predicated region body
PF: predicated region fallthrough
CT: control target
= control target key end

     0   :  { %s62_s8 = smov 96   ;;  %vm3_vm0 = vcmask 261120   ;;  %s64_s15 = smov 64   ;;  %vm9_vm1 = vcmask 1048320   ;;  %vm15_vm2 = vcmask 785920   ;;  %vm21_vm3 = vcmask 523520   ;;  %s99_s0 = inlined_call_operand.vmem [shape: f32[16,32], index: 0, kind: input, shape index: {}]   ;;  %s100_s1 = inlined_call_operand.vmem [shape: f32[1,512], index: 1, kind: output, shape index: {}]  }
   0x1   :  { %v53_v0 = vld [vmem:[%s99_s0 + $0x3] ss:$4 sm:$0xf]   ;;  %v54_v1 = vld [vmem:[%s99_s0 + $0x2] ss:$4 sm:$0xf]  }
   0x2   :  { %7 = vrot.lane.b32.xlu0 %v53_v0, %s62_s8  ;;  %v55_v2 = vld [vmem:[%s99_s0 + $0x1] ss:$4 sm:$0xf]   ;;  %v2_v3 = vld [vmem:[%s99_s0] ss:$4 sm:$0xf]  }
   0x3   :  { %s63_s0 = smov 32   ;;  %4 = vst.msk [vmem:[#allocation0] ss:$8 sm:$0xf] %vm3_vm0, %v2_v3  }
   0x4   :  { %19 = vrot.lane.b32.xlu1 %v55_v2, %s63_s0 }
   0x6   :  { %13 = vrot.lane.b32.xlu0 %v54_v1, %s64_s15 }
  0x74   :  { %v8_v4 = vpop.permute.xlu0 %7  }
  0x75   :  { %10 = vst.msk [vmem:[#allocation0] ss:$8 sm:$0xf] %vm9_vm1, %v8_v4  }
  0x76   :  { %v20_v5 = vpop.permute.xlu1 %19  }
  0x78   :  { %v14_v6 = vpop.permute.xlu0 %13  }
  0x79   :  { %16 = vst.msk [vmem:[#allocation0] ss:$8 sm:$0xf] %vm15_vm2, %v14_v6  }
  0x7a   :  { %22 = vst.msk [vmem:[#allocation0] ss:$8 sm:$0xf] %vm21_vm3, %v20_v5  }
  0x81   :  { %v27_v7 = vld [vmem:[#allocation0] sm:$0x1]  ;;  %v32_v8 = vld [vmem:[#allocation0 + $0x8] sm:$0x1]  ;;  %v38_v9 = vld [vmem:[#allocation0 + $0x10] sm:$0x1] }
  0x82   :  { %30 = vst [vmem:[%s100_s1] sm:$0x1] %v27_v7  ;;  %56 = vst [vmem:[%s100_s1 + $0x1] sm:$0x1] %v32_v8  ;;  %v45_v10 = vld [vmem:[#allocation0 + $0x18] sm:$0x1] }
  0x83   :  { %57 = vst [vmem:[%s100_s1 + $0x2] sm:$0x1] %v38_v9  ;;  %58 = vst [vmem:[%s100_s1 + $0x3] sm:$0x1] %v45_v10 }

// kernel: combine_model_forward.1
= control target key start
LH: loop header
LB: loop body
LE: loop exit
PB: predicated region body
PF: predicated region fallthrough
CT: control target
= control target key end

     0   :  { %vm201_vm0 = vcmask 1043456   ;;  %v1778_v2 = vmov 0   ;;  %vm77_vm1 = vsmask.f32 7424  ;;  %vm191_vm2 = vcmask 588800   ;;  %s2296_s1 = inlined_call_operand.vmem [shape: bf16[3,72,512], index: 1, kind: input, shape index: {}]   ;;  %s2297_s0 = inlined_call_operand.vmem [shape: bf16[36,72], index: 0, kind: input, shape index: {}]   ;;  %s2298_s3 = inlined_call_operand.vmem [shape: bf16[512,128], index: 3, kind: input, shape index: {}]   ;;  %s2299_s2 = inlined_call_operand.vmem [shape: f32[1,512], index: 2, kind: input, shape index: {}]   ;;  %s2300_s4 = inlined_call_operand.vmem [shape: f32[1,128], index: 4, kind: input, shape index: {}]   ;;  %s2301_s5 = inlined_call_operand.vmem [shape: f32[2,128], index: 5, kind: output, shape index: {}]  }
   0x1   :  { %v1467_v0 = vld [vmem:[%s2296_s1 + $0x110] sm:$0xff]  ;;  %v1468_v1 = vld [vmem:[%s2296_s1 + $0x118] sm:$0xff]  ;;  %246 = vmatprep.mubr.bf16.mxu0 %v1778_v2  ;;  %307 = vmatprep.mubr.bf16.mxu1 %v1778_v2  ;;  %v21_v22 = vld [vmem:[%s2297_s0] sm:$0xf]  ;;  %vm593_vm3 = vcmask 1046528   ;;  %vm988_vm4 = vcmask 1045504  }
   0x2   :  { %v1489_v3 = vcombine.high %v1467_v0, %v1467_v0  ;;  %v1491_v4 = vcombine.high %v1468_v1, %v1468_v1  ;;  %v1488_v5 = vcombine.low %v1467_v0, %v1467_v0  ;;  %v1490_v6 = vcombine.low %v1468_v1, %v1468_v1  ;;  %v1660_v7 = vld [vmem:[%s2296_s1 + $0xf4] ss:$16 sps:$4 sm:$0xff]   ;;  %v1662_v8 = vld [vmem:[%s2296_s1 + $0xfc] ss:$16 sps:$4 sm:$0xff]   ;;  %v1664_v11 = vld [vmem:[%s2296_s1 + $0xf0] ss:$16 sps:$4 sm:$0xff]  }
   0x3   :  { %v1665_v12 = vld [vmem:[%s2296_s1 + $0xf8] ss:$16 sps:$4 sm:$0xff]   ;;  %v1666_v13 = vld [vmem:[%s2296_s1 + $0xd4] ss:$16 sps:$4 sm:$0xff]   ;;  %v1668_v14 = vld [vmem:[%s2296_s1 + $0xdc] ss:$16 sps:$4 sm:$0xff]  }
   0x4   :  { %1492 = vmatprep.subr.msk.bf16.mxu0 %vm201_vm0, %v1489_v3  ;;  %1496 = vmatprep.subr.msk.bf16.mxu1 %vm201_vm0, %v1491_v4  ;;  %v203_v9 = vsel %vm201_vm0, %v1488_v5, 0  ;;  %v209_v10 = vsel %vm201_vm0, %v1490_v6, 0  ;;  %v1670_v15 = vld [vmem:[%s2296_s1 + $0xd0] ss:$16 sps:$4 sm:$0xff]   ;;  %v1671_v16 = vld [vmem:[%s2296_s1 + $0xd8] ss:$16 sps:$4 sm:$0xff]  }
   0x5   :  { %221 = vmatpush1.bf16.msra.mxu0 %v203_v9  ;;  %282 = vmatpush1.bf16.msra.mxu1 %v209_v10  ;;  %v1672_v17 = vld [vmem:[%s2296_s1 + $0xb4] ss:$16 sps:$4 sm:$0xff]   ;;  %v1674_v18 = vld [vmem:[%s2296_s1 + $0xbc] ss:$16 sps:$4 sm:$0xff]   ;;  %v1676_v19 = vld [vmem:[%s2296_s1 + $0xb0] ss:$16 sps:$4 sm:$0xff]  }
   0x6   :  { %222 = vmatprep.subr.bf16.mxu0 %v1660_v7  ;;  %283 = vmatprep.subr.bf16.mxu1 %v1662_v8  ;;  %v1677_v20 = vld [vmem:[%s2296_s1 + $0xb8] ss:$16 sps:$4 sm:$0xff]   ;;  %v1678_v21 = vld [vmem:[%s2296_s1 + $0x94] ss:$16 sps:$4 sm:$0xff]   ;;  %v1680_v26 = vld [vmem:[%s2296_s1 + $0x9c] ss:$16 sps:$4 sm:$0xff]  }
   0x7   :  { %v1868_v23 = vld [vmem:[%s2297_s0 + $0x4] sm:$0xf]  ;;  %v1876_v25 = vld [vmem:[%s2297_s0 + $0x8] sm:$0xff]   ;;  %v1682_v32 = vld [vmem:[%s2296_s1 + $0x90] ss:$16 sps:$4 sm:$0xff]  }
   0x8   :  { %v1871_v24 = vcombine.low %v21_v22, %v1868_v23  ;;  %v42_v27 = vld [vmem:[%s2296_s1 + $0x80] sm:$0xff]  ;;  %v86_v30 = vshll.u32 %v1876_v25, 16  ;;  %v43_v31 = vld [vmem:[%s2296_s1 + $0x88] sm:$0xff]  ;;  %v1899_v41 = vld [vmem:[%s2297_s0 + $0x10] ss:$0 sps:$4 sm:$0x33]  }
   0x9   :  { %223 = vmatpush1.bf16.msra.mxu0 %v1664_v11  ;;  %284 = vmatpush1.bf16.msra.mxu1 %v1665_v12  ;;  %v1683_v33 = vld [vmem:[%s2296_s1 + $0x98] ss:$16 sps:$4 sm:$0xff]   ;;  %v1518_v36 = vcombine.high %v42_v27, %v42_v27  ;;  %v1520_v37 = vcombine.high %v43_v31, %v43_v31  ;;  %v1517_v38 = vcombine.low %v42_v27, %v42_v27  ;;  %v1692_v43 = vld [vmem:[%s2296_s1 + $0x64] ss:$16 sps:$4 sm:$0xff]   ;;  %v90_v44 = vshrl.u32 %v1876_v25, 16 }
   0xa   :  { %224 = vmatprep.subr.bf16.mxu0 %v1666_v13  ;;  %285 = vmatprep.subr.bf16.mxu1 %v1668_v14  ;;  %v79_v28 = vshrl.u32 %v1871_v24, 16  ;;  %v81_v29 = vshll.u32 %v1871_v24, 16  ;;  %v88_v35 = vrot.slane %v86_v30, 1  ;;  %v1519_v39 = vcombine.low %v43_v31, %v43_v31  ;;  %v1695_v48 = vld [vmem:[%s2296_s1 + $0x6c] ss:$16 sps:$4 sm:$0xff]   ;;  %v1545_v4 = vld [vmem:[%s2296_s1 + $0x1a0] sm:$0xff] }
   0xb   :  { %v94_v45 = vshll.u32 %v1899_v41, 16  ;;  %v437_v46 = vsel %vm201_vm0, %v1517_v38, 0  ;;  %v1690_v49 = vld [vmem:[%s2296_s1 + $0x60] ss:$16 sps:$4 sm:$0xff]   ;;  %v1693_v50 = vld [vmem:[%s2296_s1 + $0x68] ss:$16 sps:$4 sm:$0xff]   ;;  %v1565_v7 = vcombine.high %v1545_v4, %v1545_v4  ;;  %v1564_v9 = vcombine.low %v1545_v4, %v1545_v4 }
   0xc   :  { %v83_v34 = vrot.slane %v81_v29, 1  ;;  %v443_v47 = vsel %vm201_vm0, %v1519_v39, 0  ;;  %v92_v51 = vor.u32 %v90_v44, %v88_v35  ;;  %v1699_v53 = vld [vmem:[%s2296_s1 + $0x44] ss:$16 sps:$4 sm:$0xff]   ;;  %v1702_v54 = vld [vmem:[%s2296_s1 + $0x4c] ss:$16 sps:$4 sm:$0xff]  }
   0xd   :  { %225 = vmatpush1.bf16.msra.mxu0 %v1670_v15  ;;  %286 = vmatpush1.bf16.msra.mxu1 %v1671_v16  ;;  %v96_v52 = vrot.slane %v94_v45, 1  ;;  %v1697_v56 = vld [vmem:[%s2296_s1 + $0x40] ss:$16 sps:$4 sm:$0xff]   ;;  %v1700_v57 = vld [vmem:[%s2296_s1 + $0x48] ss:$16 sps:$4 sm:$0xff]   ;;  %v98_v61 = vshrl.u32 %v1899_v41, 16 }
   0xe   :  { %226 = vmatprep.subr.bf16.mxu0 %v1672_v17  ;;  %287 = vmatprep.subr.bf16.mxu1 %v1674_v18  ;;  %v84_v40 = vor.u32 %v83_v34, %v79_v28  ;;  %v1705_v58 = vld [vmem:[%s2296_s1 + $0x24] ss:$16 sps:$4 sm:$0xff]   ;;  %v1708_v59 = vld [vmem:[%s2296_s1 + $0x2c] ss:$16 sps:$4 sm:$0xff]   ;;  %v1703_v60 = vld [vmem:[%s2296_s1 + $0x20] ss:$16 sps:$4 sm:$0xff]  }
   0xf   :  { %v97_v55 = vsel %vm77_vm1, %v92_v51, %v96_v52  ;;  %v1706_v62 = vld [vmem:[%s2296_s1 + $0x28] ss:$16 sps:$4 sm:$0xff]   ;;  %v1711_v63 = vld [vmem:[%s2296_s1 + $0x4] ss:$16 sps:$4 sm:$0xff]   ;;  %v1714_v0 = vld [vmem:[%s2296_s1 + $0xc] ss:$16 sps:$4 sm:$0xff]   ;;  %v100_v3 = vor.u32 %v98_v61, %v96_v52 }
  0x10   :  { %v89_v42 = vsel %vm77_vm1, %v84_v40, %v88_v35  ;;  %v1709_v1 = vld [vmem:[%s2296_s1] ss:$16 sps:$4 sm:$0xff]   ;;  %v1546_v5 = vld [vmem:[%s2296_s1 + $0x1a8] sm:$0xff]  ;;  %v699_v11 = vsel %vm201_vm0, %v1564_v9, 0  ;;  %v1721_v13 = vld [vmem:[%s2296_s1 + $0x184] ss:$16 sps:$4 sm:$0xff]  }
  0x11   :  { %227 = vmatpush1.bf16.msra.mxu0 %v1676_v19  ;;  %288 = vmatpush1.bf16.msra.mxu1 %v1677_v20  ;;  %v1712_v6 = vld [vmem:[%s2296_s1 + $0x8] ss:$16 sps:$4 sm:$0xff]   ;;  %v1567_v8 = vcombine.high %v1546_v5, %v1546_v5  ;;  %v1566_v10 = vcombine.low %v1546_v5, %v1546_v5  ;;  %v1724_v14 = vld [vmem:[%s2296_s1 + $0x18c] ss:$16 sps:$4 sm:$0xff]   ;;  %v1719_v15 = vld [vmem:[%s2296_s1 + $0x180] ss:$16 sps:$4 sm:$0xff]  }
  0x12   :  { %228 = vmatprep.subr.bf16.mxu0 %v1678_v21  ;;  %289 = vmatprep.subr.bf16.mxu1 %v1680_v26  ;;  %v1722_v16 = vld [vmem:[%s2296_s1 + $0x188] ss:$16 sps:$4 sm:$0xff]   ;;  %v1727_v17 = vld [vmem:[%s2296_s1 + $0x164] ss:$16 sps:$4 sm:$0xff]   ;;  %v1730_v18 = vld [vmem:[%s2296_s1 + $0x16c] ss:$16 sps:$4 sm:$0xff]  }
  0x13   :  { %v705_v12 = vsel %vm201_vm0, %v1566_v10, 0  ;;  %v1725_v19 = vld [vmem:[%s2296_s1 + $0x160] ss:$16 sps:$4 sm:$0xff]   ;;  %v1728_v20 = vld [vmem:[%s2296_s1 + $0x168] ss:$16 sps:$4 sm:$0xff]   ;;  %v595_v35 = vrot.slane %v1876_v25, 1 }
  0x14   :  { %v1733_v21 = vld [vmem:[%s2296_s1 + $0x144] ss:$16 sps:$4 sm:$0xff]   ;;  %v1736_v22 = vld [vmem:[%s2296_s1 + $0x14c] ss:$16 sps:$4 sm:$0xff]   ;;  %v1734_v26 = vld [vmem:[%s2296_s1 + $0x148] ss:$16 sps:$4 sm:$0xff]  }
  0x15   :  { %229 = vmatpush1.bf16.msra.mxu0 %v1682_v32  ;;  %290 = vmatpush1.bf16.msra.mxu1 %v1683_v33  ;;  %v1740_v27 = vld [vmem:[%s2296_s1 + $0x124] ss:$16 sps:$4 sm:$0xff]   ;;  %v1743_v28 = vld [vmem:[%s2296_s1 + $0x12c] ss:$16 sps:$4 sm:$0xff]   ;;  %v570_v29 = vld [vmem:[%s2297_s0] sm:$0xe] }
  0x16   :  { %1521 = vmatprep.subr.msk.bf16.mxu0 %vm201_vm0, %v1518_v36  ;;  %1525 = vmatprep.subr.msk.bf16.mxu1 %vm201_vm0, %v1520_v37  ;;  %v1737_v30 = vld [vmem:[%s2297_s0 + $0x10] ss:$0 sps:$4 sm:$0x11]   ;;  %v1741_v32 = vld [vmem:[%s2296_s1 + $0x128] ss:$16 sps:$4 sm:$0xff]   ;;  %v1547_v33 = vcombine.low %v570_v29, %v1868_v23  ;;  %v597_v23 = vrot.slane %v1899_v41, 1 }
  0x17   :  { %v1738_v31 = vld [vmem:[%s2296_s1 + $0x120] ss:$16 sps:$4 sm:$0xff]   ;;  %v1746_v38 = vld [vmem:[%s2298_s3 + $0x38] sm:$0xff]   ;;  %v1753_v44 = vld [vmem:[%s2298_s3 + $0x68] sm:$0xff]  }
  0x18   :  { %1493 = vmatmul.mubr.msk.bf16.vlgmr.msra.gmra.mxu0 %vm191_vm2, %v89_v42  ;;  %1497 = vmatmul.mubr.msk.bf16.vlgmr.msra.gmra.mxu1 %vm191_vm2, %v89_v42  ;;  %v594_v34 = vrot.slane %v1547_v33, 1  ;;  %v598_v37 = vsel %vm593_vm3, %v595_v35, %v597_v23  ;;  %v1747_v39 = vld [vmem:[%s2298_s3 + $0xf8] sm:$0xff]   ;;  %v1749_v40 = vld [vmem:[%s2298_s3 + $0x70] sm:$0xff]   ;;  %v1754_v45 = vld [vmem:[%s2298_s3 + $0x28] sm:$0xff]  }
  0x19   :  { %455 = vmatpush1.bf16.msra.mxu0 %v437_v46  ;;  %516 = vmatpush1.bf16.msra.mxu1 %v443_v47  ;;  %v1750_v41 = vld [vmem:[%s2298_s3 + $0x30] sm:$0xff]   ;;  %v1755_v46 = vld [vmem:[%s2298_s3 + $0xe8] sm:$0xff]   ;;  %v1760_v51 = vld [vmem:[%s2298_s3 + $0xa0] sm:$0xff]  }
  0x1a   :  { %456 = vmatprep.subr.bf16.mxu0 %v1692_v43  ;;  %517 = vmatprep.subr.bf16.mxu1 %v1695_v48  ;;  %v596_v36 = vsel %vm593_vm3, %v594_v34, %v595_v35  ;;  %v1751_v42 = vld [vmem:[%s2298_s3 + $0xf0] sm:$0xff]   ;;  %v1756_v47 = vld [vmem:[%s2298_s3 + $0xa8] sm:$0xff]   ;;  %v1757_v48 = vld [vmem:[%s2298_s3 + $0x60] sm:$0xff]  }
  0x1b   :  { %256 = vmatprep.mubr.bf16.mxu0 %v1778_v2  ;;  %317 = vmatprep.mubr.bf16.mxu1 %v1778_v2  ;;  %v1752_v43 = vld [vmem:[%s2298_s3 + $0xb0] sm:$0xff]   ;;  %v1761_v52 = vld [vmem:[%s2298_s3 + $0x58] sm:$0xff]   ;;  %v1770_v61 = vld [vmem:[%s2298_s3 + $0x8] sm:$0xff]  }
  0x1c   :  { %v1776_v4 = vld [vmem:[%s2298_s3 + $0x80] sm:$0xff]  }
  0x1d   :  { %457 = vmatpush1.bf16.msra.mxu0 %v1690_v49  ;;  %518 = vmatpush1.bf16.msra.mxu1 %v1693_v50  ;;  %v1758_v49 = vld [vmem:[%s2298_s3 + $0x20] sm:$0xff]  }
  0x1e   :  { %458 = vmatprep.subr.bf16.mxu0 %v1699_v53  ;;  %519 = vmatprep.subr.bf16.mxu1 %v1702_v54  ;;  %v1759_v50 = vld [vmem:[%s2298_s3 + $0xe0] sm:$0xff]   ;;  %v1762_v53 = vld [vmem:[%s2298_s3 + $0x18] sm:$0xff]  }
  0x1f   :  { %v1763_v54 = vld [vmem:[%s2298_s3 + $0xd8] sm:$0xff]  }
  0x20   :  { %1494 = vmatmul.mubr.msk.bf16.gmra.mxu0 %vm191_vm2, %v97_v55  ;;  %1498 = vmatmul.mubr.msk.bf16.gmra.mxu1 %vm191_vm2, %v97_v55  ;;  %v1764_v55 = vld [vmem:[%s2298_s3 + $0x98] sm:$0xff]  }
  0x21   :  { %459 = vmatpush1.bf16.msra.mxu0 %v1697_v56  ;;  %520 = vmatpush1.bf16.msra.mxu1 %v1700_v57  ;;  %v1765_v56 = vld [vmem:[%s2298_s3 + $0x50] sm:$0xff]  }
  0x22   :  { %266 = vmatprep.mubr.bf16.mxu0 %v1778_v2  ;;  %327 = vmatprep.mubr.bf16.mxu1 %v1778_v2  ;;  %v1766_v57 = vld [vmem:[%s2298_s3 + $0x10] sm:$0xff]  }
  0x23   :  { %460 = vmatprep.subr.bf16.mxu0 %v1705_v58  ;;  %521 = vmatprep.subr.bf16.mxu1 %v1708_v59  ;;  %v1767_v58 = vld [vmem:[%s2298_s3 + $0xd0] sm:$0xff]  }
  0x24   :  { %v1768_v59 = vld [vmem:[%s2298_s3 + $0x90] sm:$0xff]  }
  0x25   :  { %461 = vmatpush1.bf16.msra.mxu0 %v1703_v60  ;;  %522 = vmatpush1.bf16.msra.mxu1 %v1706_v62  ;;  %v1769_v60 = vld [vmem:[%s2298_s3 + $0x48] sm:$0xff]  }
  0x26   :  { %462 = vmatprep.subr.bf16.mxu0 %v1711_v63  ;;  %523 = vmatprep.subr.bf16.mxu1 %v1714_v0  ;;  %v1771_v62 = vld [vmem:[%s2298_s3 + $0xc8] sm:$0xff]   ;;  %v1773_v0 = vld [vmem:[%s2298_s3 + $0x40] sm:$0xff]  }
  0x27   :  { %v1772_v63 = vld [vmem:[%s2298_s3 + $0x88] sm:$0xff]  }
  0x28   :  { %1495 = vmatmul.mubr.msk.bf16.gmra.mxu0 %vm191_vm2, %v100_v3  ;;  %1499 = vmatmul.mubr.msk.bf16.gmra.mxu1 %vm191_vm2, %v100_v3  ;;  %v1775_v3 = vld [vmem:[%s2298_s3 + $0xc0] sm:$0xff]  }
  0x29   :  { %463 = vmatpush1.bf16.msra.mxu0 %v1709_v1  ;;  %524 = vmatpush1.bf16.msra.mxu1 %v1712_v6  ;;  %v1774_v1 = vld [vmem:[%s2298_s3] sm:$0xff]  }
  0x2a   :  { %480 = vmatprep.mubr.bf16.mxu0 %v1778_v2  ;;  %541 = vmatprep.mubr.bf16.mxu1 %v1778_v2 }
  0x2b   :  { %1568 = vmatprep.subr.msk.bf16.mxu0 %vm201_vm0, %v1565_v7  ;;  %1572 = vmatprep.subr.msk.bf16.mxu1 %vm201_vm0, %v1567_v8 }
  0x30   :  { %1522 = vmatmul.mubr.msk.bf16.vlgmr.msra.gmra.mxu0 %vm191_vm2, %v1871_v24  ;;  %1526 = vmatmul.mubr.msk.bf16.vlgmr.msra.gmra.mxu1 %vm191_vm2, %v1871_v24  ;;  %v1731_v24 = vld [vmem:[%s2296_s1 + $0x140] ss:$16 sps:$4 sm:$0xff]  }
  0x31   :  { %717 = vmatpush1.bf16.msra.mxu0 %v699_v11  ;;  %778 = vmatpush1.bf16.msra.mxu1 %v705_v12 }
  0x32   :  { %718 = vmatprep.subr.bf16.mxu0 %v1721_v13  ;;  %779 = vmatprep.subr.bf16.mxu1 %v1724_v14 }
  0x33   :  { %490 = vmatprep.mubr.bf16.mxu0 %v1778_v2  ;;  %551 = vmatprep.mubr.bf16.mxu1 %v1778_v2 }
  0x35   :  { %719 = vmatpush1.bf16.msra.mxu0 %v1719_v15  ;;  %780 = vmatpush1.bf16.msra.mxu1 %v1722_v16 }
  0x36   :  { %720 = vmatprep.subr.bf16.mxu0 %v1727_v17  ;;  %781 = vmatprep.subr.bf16.mxu1 %v1730_v18 }
  0x38   :  { %1523 = vmatmul.mubr.msk.bf16.gmra.mxu0 %vm191_vm2, %v1876_v25  ;;  %1527 = vmatmul.mubr.msk.bf16.gmra.mxu1 %vm191_vm2, %v1876_v25  ;;  %v1745_v25 = vld [vmem:[%s2298_s3 + $0x78] sm:$0xff]  }
  0x39   :  { %721 = vmatpush1.bf16.msra.mxu0 %v1725_v19  ;;  %782 = vmatpush1.bf16.msra.mxu1 %v1728_v20 }
  0x3a   :  { %500 = vmatprep.mubr.bf16.mxu0 %v1778_v2  ;;  %561 = vmatprep.mubr.bf16.mxu1 %v1778_v2 }
  0x3b   :  { %722 = vmatprep.subr.bf16.mxu0 %v1733_v21  ;;  %783 = vmatprep.subr.bf16.mxu1 %v1736_v22 }
  0x3d   :  { %723 = vmatpush1.bf16.msra.mxu0 %v1731_v24  ;;  %784 = vmatpush1.bf16.msra.mxu1 %v1734_v26 }
  0x3e   :  { %724 = vmatprep.subr.bf16.mxu0 %v1740_v27  ;;  %785 = vmatprep.subr.bf16.mxu1 %v1743_v28 }
  0x40   :  { %1524 = vmatmul.mubr.msk.bf16.gmra.mxu0 %vm191_vm2, %v1737_v30  ;;  %1528 = vmatmul.mubr.msk.bf16.gmra.mxu1 %vm191_vm2, %v1737_v30 }
  0x41   :  { %725 = vmatpush1.bf16.msra.mxu0 %v1738_v31  ;;  %786 = vmatpush1.bf16.msra.mxu1 %v1741_v32 }
  0x42   :  { %742 = vmatprep.mubr.bf16.mxu0 %v1778_v2  ;;  %803 = vmatprep.mubr.bf16.mxu1 %v1778_v2 }
  0x43   :  { %1609 = vmatprep.subr.bf16.mxu0 %v1745_v25  ;;  %1631 = vmatprep.subr.bf16.mxu1 %v1747_v39 }
  0x48   :  { %1569 = vmatmul.mubr.msk.bf16.vlgmr.msra.gmra.mxu0 %vm191_vm2, %v596_v36  ;;  %1573 = vmatmul.mubr.msk.bf16.vlgmr.msra.gmra.mxu1 %vm191_vm2, %v596_v36 }
  0x49   :  { %752 = vmatprep.mubr.bf16.mxu0 %v1778_v2  ;;  %813 = vmatprep.mubr.bf16.mxu1 %v1778_v2 }
  0x4a   :  { %1610 = vmatpush3.bf16.msra.mxu0 %v1746_v38 }
  0x4b   :  { %1611 = vmatprep.subr.bf16.mxu0 %v1749_v40 }
  0x4e   :  { %1612 = vmatpush3.bf16.msra.mxu0 %v1750_v41 }
  0x4f   :  { %1613 = vmatprep.subr.bf16.mxu0 %v1753_v44 }
  0x50   :  { %1570 = vmatmul.mubr.msk.bf16.gmra.mxu0 %vm191_vm2, %v598_v37  ;;  %1574 = vmatmul.mubr.msk.bf16.gmra.mxu1 %vm191_vm2, %v598_v37 }
  0x51   :  { %762 = vmatprep.mubr.bf16.mxu0 %v1778_v2  ;;  %823 = vmatprep.mubr.bf16.mxu1 %v1778_v2  ;;  %v1748_v2 = vld [vmem:[%s2298_s3 + $0xb8] sm:$0xff]  }
  0x52   :  { %1632 = vmatpush3.bf16.msra.mxu1 %v1748_v2  ;;  %1614 = vmatpush3.bf16.msra.mxu0 %v1754_v45 }
  0x53   :  { %1633 = vmatprep.subr.bf16.mxu1 %v1751_v42  ;;  %1615 = vmatprep.subr.bf16.mxu0 %v1757_v48  ;;  %v2302_v42 = vlaneseq }
  0x56   :  { %1634 = vmatpush3.bf16.msra.mxu1 %v1752_v43  ;;  %1616 = vmatpush3.bf16.msra.mxu0 %v1758_v49 }
  0x57   :  { %1635 = vmatprep.subr.bf16.mxu1 %v1755_v46  ;;  %1617 = vmatprep.subr.bf16.mxu0 %v1761_v52 }
  0x58   :  { %1571 = vmatmul.mubr.msk.bf16.gmra.mxu0 %vm191_vm2, %v597_v23  ;;  %1575 = vmatmul.mubr.msk.bf16.gmra.mxu1 %vm191_vm2, %v597_v23 }
  0x5a   :  { %1636 = vmatpush3.bf16.msra.mxu1 %v1756_v47  ;;  %1618 = vmatpush3.bf16.msra.mxu0 %v1762_v53  ;;  %v2200_v47 = vshrl.u32 %v2302_v42, 7 }
  0x5b   :  { %1637 = vmatprep.subr.bf16.mxu1 %v1759_v50  ;;  %1619 = vmatprep.subr.bf16.mxu0 %v1765_v56  ;;  %v1779_v50 = vmov 1966171168  }
  0x5e   :  { %1638 = vmatpush3.bf16.msra.mxu1 %v1760_v51  ;;  %1620 = vmatpush3.bf16.msra.mxu0 %v1766_v57  ;;  %v949_v51 = vunpack.c.l.s4 %v1779_v50  ;;  %v852_v57 = vld [vmem:[%s2299_s2] sm:$0xf] }
  0x5f   :  { %1639 = vmatprep.subr.bf16.mxu1 %v1763_v54  ;;  %1621 = vmatprep.subr.bf16.mxu0 %v1769_v60  ;;  %v856_v54 = vsub.s32 0, %v2200_v47  ;;  %v868_v60 = vsub.s32 3, %v2200_v47 }
  0x61   :  { %v2219_v42 = vrot.slane %v852_v57, %v868_v60 }
  0x62   :  { %1640 = vmatpush3.bf16.msra.mxu1 %v1764_v55  ;;  %1622 = vmatpush3.bf16.msra.mxu0 %v1770_v61  ;;  %v950_v61 = vunpack.c.0.s8 %v949_v51 }
  0x63   :  { %1641 = vmatprep.subr.bf16.mxu1 %v1767_v58  ;;  %1623 = vmatprep.subr.bf16.mxu0 %v1773_v0  ;;  %v864_v58 = vsub.s32 2, %v2200_v47 }
  0x66   :  { %1642 = vmatpush3.bf16.msra.mxu1 %v1768_v59  ;;  %1624 = vmatpush3.bf16.msra.mxu0 %v1774_v1  ;;  %v860_v59 = vsub.s32 1, %v2200_v47 }
  0x67   :  { %1643 = vmatprep.subr.bf16.mxu1 %v1771_v62 }
  0x6a   :  { %1644 = vmatpush3.bf16.msra.mxu1 %v1772_v63 }
  0x6b   :  { %1645 = vmatprep.subr.bf16.mxu1 %v1775_v3 }
  0x6e   :  { %1646 = vmatpush3.bf16.msra.mxu1 %v1776_v4 }
  0xd8   :  { %v248_v5 = vpop.f32.mrf.mxu0  ;;  %v309_v6 = vpop.f32.mrf.mxu1 }
  0xda   :  { %v250_v7 = vpop.f32.mrf.mxu0  ;;  %v311_v8 = vpop.f32.mrf.mxu1 }
  0xdc   :  { %v2159_v9 = vpop.f32.mrf.mxu0  ;;  %v2161_v10 = vpop.f32.mrf.mxu1 }
  0xde   :  { %v2163_v11 = vpop.f32.mrf.mxu0  ;;  %v2165_v12 = vpop.f32.mrf.mxu1 }
  0xe0   :  { %v2167_v13 = vpop.f32.mrf.mxu0  ;;  %v2169_v14 = vpop.f32.mrf.mxu1 }
  0xe2   :  { %v2171_v15 = vpop.f32.mrf.mxu0  ;;  %v2173_v16 = vpop.f32.mrf.mxu1 }
  0xe4   :  { %v2175_v17 = vpop.f32.mrf.mxu0  ;;  %v2177_v18 = vpop.f32.mrf.mxu1 }
  0xe6   :  { %v2179_v19 = vpop.f32.mrf.mxu0  ;;  %v2181_v20 = vpop.f32.mrf.mxu1 }
  0xe8   :  { %v2183_v21 = vpop.f32.mrf.mxu0  ;;  %v2185_v22 = vpop.f32.mrf.mxu1 }
  0xea   :  { %v2187_v24 = vpop.f32.mrf.mxu0  ;;  %v2189_v26 = vpop.f32.mrf.mxu1 }
  0xec   :  { %v272_v27 = vpop.f32.mrf.mxu0  ;;  %v333_v28 = vpop.f32.mrf.mxu1 }
  0xed   :  { %v2213_v27 = vrot.slane %v852_v57, %v856_v54 }
  0xee   :  { %v273_v29 = vpop.f32.mrf.mxu0  ;;  %v334_v30 = vpop.f32.mrf.mxu1 }
  0xef   :  { %v2215_v30 = vrot.slane %v852_v57, %v864_v58 }
  0xf0   :  { %v482_v31 = vpop.f32.mrf.mxu0  ;;  %v543_v32 = vpop.f32.mrf.mxu1 }
  0xf1   :  { %v483_v62 = vadd.f32 %v482_v31, %v248_v5  ;;  %v544_v63 = vadd.f32 %v543_v32, %v309_v6  ;;  %v2222_v5 = vsub.s32 %v950_v61, %v2200_v47 }
  0xf2   :  { %v484_v33 = vpop.f32.mrf.mxu0  ;;  %v545_v34 = vpop.f32.mrf.mxu1 }
  0xf3   :  { %v485_v3 = vadd.f32 %v484_v33, %v250_v7  ;;  %v546_v4 = vadd.f32 %v545_v34, %v311_v8 }
  0xf4   :  { %v486_v35 = vpop.f32.mrf.mxu0  ;;  %v547_v36 = vpop.f32.mrf.mxu1 }
  0xf5   :  { %v487_v6 = vadd.f32 %v486_v35, %v2159_v9  ;;  %v548_v7 = vadd.f32 %v547_v36, %v2161_v10 }
  0xf6   :  { %v488_v23 = vpop.f32.mrf.mxu0  ;;  %v549_v37 = vpop.f32.mrf.mxu1 }
  0xf7   :  { %v489_v8 = vadd.f32 %v488_v23, %v2163_v11  ;;  %v550_v31 = vadd.f32 %v549_v37, %v2165_v12 }
  0xf8   :  { %v492_v25 = vpop.f32.mrf.mxu0  ;;  %v553_v38 = vpop.f32.mrf.mxu1 }
  0xf9   :  { %v493_v34 = vadd.f32 %v492_v25, %v2167_v13  ;;  %v554_v51 = vadd.f32 %v553_v38, %v2169_v14 }
  0xfa   :  { %v494_v39 = vpop.f32.mrf.mxu0  ;;  %v555_v2 = vpop.f32.mrf.mxu1 }
  0xfb   :  { %v495_v54 = vadd.f32 %v494_v39, %v2171_v15 }
  0xfc   :  { %v496_v40 = vpop.f32.mrf.mxu0  ;;  %v557_v41 = vpop.f32.mrf.mxu1 }
  0xfd   :  { %v497_v14 = vadd.f32 %v496_v40, %v2175_v17  ;;  %v558_v15 = vadd.f32 %v557_v41, %v2177_v18 }
  0xfe   :  { %v2191_v43 = vpop.f32.mrf.mxu0  ;;  %v2193_v44 = vpop.f32.mrf.mxu1 }
 0x100   :  { %v2195_v45 = vpop.f32.mrf.mxu0  ;;  %v2197_v46 = vpop.f32.mrf.mxu1 }
 0x102   :  { %v2202_v48 = vpop.f32.mrf.mxu0  ;;  %v2204_v49 = vpop.f32.mrf.mxu1 }
 0x104   :  { %v506_v52 = vpop.f32.mrf.mxu0  ;;  %v567_v53 = vpop.f32.mrf.mxu1 }
 0x105   :  { %v2217_v52 = vrot.slane %v852_v57, %v860_v59  ;;  %v556_v57 = vadd.f32 %v555_v2, %v2173_v16 }
 0x106   :  { %v507_v55 = vpop.f32.mrf.mxu0  ;;  %v568_v56 = vpop.f32.mrf.mxu1 }
 0x108   :  { %v744_v0 = vpop.f32.mrf.mxu0  ;;  %v805_v1 = vpop.f32.mrf.mxu1 }
 0x109   :  { %v832_v28 = vadd.f32 %v744_v0, %v483_v62  ;;  %v834_v29 = vadd.f32 %v805_v1, %v544_v63 }
 0x10a   :  { %v746_v50 = vpop.f32.mrf.mxu0  ;;  %v807_v53 = vpop.f32.mrf.mxu1 }
 0x10b   :  { %v833_v55 = vadd.f32 %v746_v50, %v485_v3  ;;  %v835_v56 = vadd.f32 %v807_v53, %v546_v4  ;;  %v874_v58 = vadd.f32 %v2213_v27, %v832_v28  ;;  %v876_v9 = vadd.f32 %v2215_v30, %v834_v29 }
 0x10c   :  { %v748_v32 = vpop.f32.mrf.mxu0  ;;  %v809_v33 = vpop.f32.mrf.mxu1 }
 0x10d   :  { %v836_v35 = vadd.f32 %v748_v32, %v487_v6  ;;  %v838_v10 = vadd.f32 %v809_v33, %v548_v7  ;;  %v875_v12 = vadd.f32 %v2217_v52, %v833_v55  ;;  %v877_v23 = vadd.f32 %v2219_v42, %v835_v56 }
 0x10e   :  { %v750_v36 = vpop.f32.mrf.mxu0  ;;  %v811_v11 = vpop.f32.mrf.mxu1  ;;  %v894_v62 = vmax.f32 %v874_v58, 0.0  ;;  %v896_v63 = vmax.f32 %v876_v9, 0.0  ;;  %v499_v6 = vadd.f32 %v2191_v43, %v2179_v19  ;;  %v560_v7 = vadd.f32 %v2193_v44, %v2181_v20 }
 0x10f   :  { %v837_v37 = vadd.f32 %v750_v36, %v489_v8  ;;  %v839_v13 = vadd.f32 %v811_v11, %v550_v31  ;;  %v878_v16 = vadd.f32 %v2213_v27, %v836_v35  ;;  %v880_v25 = vadd.f32 %v2215_v30, %v838_v10 }
 0x110   :  { %v754_v38 = vpop.f32.mrf.mxu0  ;;  %v815_v39 = vpop.f32.mrf.mxu1  ;;  %v895_v40 = vmax.f32 %v875_v12, 0.0  ;;  %v897_v18 = vmax.f32 %v877_v23, 0.0  ;;  %v503_v35 = vadd.f32 %v2195_v45, %v2183_v21  ;;  %v564_v10 = vadd.f32 %v2197_v46, %v2185_v22 }
 0x111   :  { %v879_v2 = vadd.f32 %v2217_v52, %v837_v37  ;;  %v881_v59 = vadd.f32 %v2219_v42, %v839_v13  ;;  %v840_v60 = vadd.f32 %v754_v38, %v493_v34  ;;  %v842_v61 = vadd.f32 %v815_v39, %v554_v51 }
 0x112   :  { %v898_v0 = vmax.f32 %v878_v16, 0.0  ;;  %v900_v1 = vmax.f32 %v880_v25, 0.0  ;;  %v756_v3 = vpop.f32.mrf.mxu0  ;;  %v817_v17 = vpop.f32.mrf.mxu1 }
 0x113   :  { %v899_v41 = vmax.f32 %v879_v2, 0.0  ;;  %v901_v4 = vmax.f32 %v881_v59, 0.0  ;;  %v882_v50 = vadd.f32 %v2213_v27, %v840_v60  ;;  %v884_v53 = vadd.f32 %v2215_v30, %v842_v61 }
 0x114   :  { %v914_v28 = vadd.f32 %v898_v0, %v894_v62  ;;  %v928_v29 = vadd.f32 %v900_v1, %v896_v63  ;;  %v758_v55 = vpop.f32.mrf.mxu0  ;;  %v819_v56 = vpop.f32.mrf.mxu1  ;;  %v841_v34 = vadd.f32 %v756_v3, %v495_v54  ;;  %v843_v51 = vadd.f32 %v817_v17, %v556_v57 }
 0x115   :  { %v921_v8 = vadd.f32 %v899_v41, %v895_v40  ;;  %v935_v31 = vadd.f32 %v901_v4, %v897_v18  ;;  %v902_v12 = vmax.f32 %v882_v50, 0.0  ;;  %v904_v20 = vmax.f32 %v884_v53, 0.0 }
 0x116   :  { %v915_v32 = vrot.slane %v914_v28, 4  ;;  %v929_v33 = vrot.slane %v928_v29, 4  ;;  %v760_v58 = vpop.f32.mrf.mxu0  ;;  %v821_v9 = vpop.f32.mrf.mxu1  ;;  %v844_v54 = vadd.f32 %v758_v55, %v497_v14  ;;  %v846_v57 = vadd.f32 %v819_v56, %v558_v15 }
 0x117   :  { %v922_v36 = vrot.slane %v921_v8, 4  ;;  %v936_v11 = vrot.slane %v935_v31, 4  ;;  %v883_v38 = vadd.f32 %v2217_v52, %v841_v34  ;;  %v885_v21 = vadd.f32 %v2219_v42, %v843_v51 }
 0x118   :  { %v916_v19 = vadd.f32 %v915_v32, %v914_v28  ;;  %v930_v43 = vadd.f32 %v929_v33, %v928_v29  ;;  %v764_v44 = vpop.f32.mrf.mxu0  ;;  %v825_v23 = vpop.f32.mrf.mxu1  ;;  %v886_v2 = vadd.f32 %v2213_v27, %v844_v54  ;;  %v888_v59 = vadd.f32 %v2215_v30, %v846_v57 }
 0x119   :  { %v923_v37 = vadd.f32 %v922_v36, %v921_v8  ;;  %v937_v13 = vadd.f32 %v936_v11, %v935_v31  ;;  %v845_v62 = vadd.f32 %v760_v58, %v499_v6  ;;  %v847_v63 = vadd.f32 %v821_v9, %v560_v7 }
 0x11a   :  { %v917_v16 = vrot.slane %v916_v19, 2  ;;  %v931_v25 = vrot.slane %v930_v43, 2  ;;  %v766_v45 = vpop.f32.mrf.mxu0  ;;  %v827_v22 = vpop.f32.mrf.mxu1  ;;  %v505_v0 = vadd.f32 %v2202_v48, %v2187_v24  ;;  %v566_v1 = vadd.f32 %v2204_v49, %v2189_v26  ;;  %v1576_v24 = vld [vmem:[%s2300_s4] ss:$0 sm:$0xff] }
 0x11b   :  { %v924_v46 = vrot.slane %v923_v37, 2  ;;  %v938_v39 = vrot.slane %v937_v13, 2  ;;  %v887_v41 = vadd.f32 %v2217_v52, %v845_v62  ;;  %v889_v4 = vadd.f32 %v2219_v42, %v847_v63 }
 0x11c   :  { %v918_v60 = vadd.f32 %v917_v16, %v916_v19  ;;  %v932_v61 = vadd.f32 %v931_v25, %v930_v43  ;;  %v768_v14 = vpop.f32.mrf.mxu0  ;;  %v829_v15 = vpop.f32.mrf.mxu1  ;;  %v989_v55 = vrot.slane %v902_v12, 2  ;;  %v995_v56 = vrot.slane %v904_v20, 2 }
 0x11d   :  { %v925_v3 = vadd.f32 %v924_v46, %v923_v37  ;;  %v939_v17 = vadd.f32 %v938_v39, %v937_v13  ;;  %v2303_v6 = vlaneseq  ;;  %v903_v26 = vmax.f32 %v883_v38, 0.0 }
 0x11e   :  { %v919_v40 = vrot.slane %v918_v60, 1  ;;  %v933_v18 = vrot.slane %v932_v61, 1  ;;  %v769_v28 = vpop.f32.mrf.mxu0  ;;  %v830_v29 = vpop.f32.mrf.mxu1  ;;  %v905_v48 = vmax.f32 %v885_v21, 0.0  ;;  %v906_v49 = vmax.f32 %v886_v2, 0.0 }
 0x11f   :  { %v926_v50 = vrot.slane %v925_v3, 1  ;;  %v940_v53 = vrot.slane %v939_v17, 1  ;;  %vm2263_vm5 = vcmp.lt.s32.totalorder %v2303_v6, 512  ;;  %v908_v7 = vmax.f32 %v888_v59, 0.0 }
 0x120   :  { %v920_v8 = vadd.f32 %v919_v40, %v918_v60  ;;  %v934_v31 = vadd.f32 %v933_v18, %v932_v61  ;;  %v907_v34 = vmax.f32 %v887_v41, 0.0  ;;  %v909_v51 = vmax.f32 %v889_v4, 0.0 }
 0x121   :  { %v927_v32 = vadd.f32 %v926_v50, %v925_v3  ;;  %v941_v33 = vadd.f32 %v940_v53, %v939_v17  ;;  %v848_v58 = vadd.f32 %v764_v44, %v503_v35  ;;  %v850_v9 = vadd.f32 %v825_v23, %v564_v10 }
 0x122   :  { %v849_v19 = vadd.f32 %v766_v45, %v505_v0  ;;  %v851_v43 = vadd.f32 %v827_v22, %v566_v1  ;;  %v990_v12 = vrot.slane %v906_v49, 2  ;;  %v996_v20 = vrot.slane %v908_v7, 2 }
 0x123   :  { %v946_v36 = vcombine.low %v920_v8, %v927_v32  ;;  %v947_v11 = vcombine.low %v934_v31, %v941_v33  ;;  %v890_v37 = vadd.f32 %v2213_v27, %v848_v58  ;;  %v892_v13 = vadd.f32 %v2215_v30, %v850_v9 }
 0x124   :  { %v891_v16 = vadd.f32 %v2217_v52, %v849_v19  ;;  %v893_v25 = vadd.f32 %v2219_v42, %v851_v43  ;;  %v993_v35 = vrot.slane %v907_v34, 2  ;;  %v999_v10 = vrot.slane %v909_v51, 2 }
 0x125   :  { %v954_v54 = vrot.slane %v946_v36, %v2222_v5  ;;  %v961_v57 = vrot.slane %v947_v11, %v2222_v5  ;;  %v910_v44 = vmax.f32 %v890_v37, 0.0  ;;  %v912_v23 = vmax.f32 %v892_v13, 0.0 }
 0x126   :  { %v992_v21 = vrot.slane %v903_v26, 2  ;;  %v911_v45 = vmax.f32 %v891_v16, 0.0  ;;  %v913_v22 = vmax.f32 %v893_v25, 0.0  ;;  %v998_v46 = vrot.slane %v905_v48, 2 }
 0x127   :  { %v962_v38 = vcombine.low %v954_v54, %v961_v57  ;;  %v991_v27 = vsel %vm988_vm4, %v989_v55, %v990_v12  ;;  %v1001_v30 = vrot.slane %v910_v44, 2  ;;  %v1005_v39 = vrot.slane %v912_v23, 2 }
 0x128   :  { %v997_v59 = vsel %vm988_vm4, %v995_v56, %v996_v20  ;;  %v1003_v52 = vrot.slane %v911_v45, 2  ;;  %v1007_v60 = vrot.slane %v913_v22, 2  ;;  %v994_v42 = vsel %vm988_vm4, %v992_v21, %v993_v35 }
 0x129   :  { %v969_v2 = vrot.slane %v962_v38, %v2222_v5  ;;  %v1000_v61 = vsel %vm988_vm4, %v998_v46, %v999_v10  ;;  %v1002_v62 = vsel %vm988_vm4, %v990_v12, %v1001_v30  ;;  %v1006_v63 = vsel %vm988_vm4, %v996_v20, %v1005_v39 }
 0x12a   :  { %v1017_v14 = vadd.f32 %v1002_v62, %v991_v27  ;;  %v1031_v15 = vadd.f32 %v1006_v63, %v997_v59  ;;  %v1004_v0 = vsel %vm988_vm4, %v993_v35, %v1003_v52  ;;  %v1008_v1 = vsel %vm988_vm4, %v999_v10, %v1007_v60 }
 0x12b   :  { %975 = vst.msk [vmem:[#allocation2] ss:$2 sm:$0xf] %vm2263_vm5, %v969_v2  ;;  %v1024_v3 = vadd.f32 %v1004_v0, %v994_v42  ;;  %v1038_v17 = vadd.f32 %v1008_v1, %v1000_v61  ;;  %v1780_v37 = vmov 1983009808  }
 0x12c   :  { %v1018_v40 = vrot.slane %v1017_v14, 4  ;;  %v1032_v18 = vrot.slane %v1031_v15, 4  ;;  %v1080_v13 = vunpack.c.l.s4 %v1780_v37 }
 0x12d   :  { %v1025_v41 = vrot.slane %v1024_v3, 4  ;;  %v1039_v4 = vrot.slane %v1038_v17, 4 }
 0x12e   :  { %v1019_v28 = vadd.f32 %v1018_v40, %v1017_v14  ;;  %v1033_v29 = vadd.f32 %v1032_v18, %v1031_v15  ;;  %v1081_v57 = vunpack.c.0.s8 %v1080_v13 }
 0x12f   :  { %v1026_v50 = vadd.f32 %v1025_v41, %v1024_v3  ;;  %v1040_v53 = vadd.f32 %v1039_v4, %v1038_v17 }
 0x130   :  { %v1020_v55 = vrot.slane %v1019_v28, 2  ;;  %v1034_v56 = vrot.slane %v1033_v29, 2  ;;  %v1084_v16 = vsub.s32 %v1081_v57, %v2200_v47 }
 0x131   :  { %v1027_v6 = vrot.slane %v1026_v50, 2  ;;  %v1041_v26 = vrot.slane %v1040_v53, 2 }
 0x132   :  { %v1021_v48 = vadd.f32 %v1020_v55, %v1019_v28  ;;  %v1035_v49 = vadd.f32 %v1034_v56, %v1033_v29 }
 0x133   :  { %v1028_v7 = vadd.f32 %v1027_v6, %v1026_v50  ;;  %v1042_v8 = vadd.f32 %v1041_v26, %v1040_v53 }
 0x134   :  { %v1022_v31 = vrot.slane %v1021_v48, 1  ;;  %v1036_v32 = vrot.slane %v1035_v49, 1 }
 0x135   :  { %v1029_v33 = vrot.slane %v1028_v7, 1  ;;  %v1043_v34 = vrot.slane %v1042_v8, 1 }
 0x136   :  { %v1023_v51 = vadd.f32 %v1022_v31, %v1021_v48  ;;  %v1037_v58 = vadd.f32 %v1036_v32, %v1035_v49 }
 0x137   :  { %v1030_v9 = vadd.f32 %v1029_v33, %v1028_v7  ;;  %v1044_v36 = vadd.f32 %v1043_v34, %v1042_v8 }
 0x139   :  { %v1049_v11 = vcombine.low %v1023_v51, %v1030_v9  ;;  %v1050_v19 = vcombine.low %v1037_v58, %v1044_v36 }
 0x13b   :  { %v1057_v43 = vrot.slane %v1049_v11, %v2222_v5  ;;  %v1064_v12 = vrot.slane %v1050_v19, %v2222_v5 }
 0x13d   :  { %v1065_v20 = vcombine.low %v1057_v43, %v1064_v12 }
 0x13f   :  { %v1072_v54 = vrot.slane %v1065_v20, %v2222_v5 }
 0x141   :  { %1075 = vst.msk [vmem:[#allocation2 + $0x1] ss:$2 sm:$0xf] %vm2263_vm5, %v1072_v54 }
 0x148   :  { %v1076_v25 = vld [vmem:[#allocation2] sm:$0xff] }
 0x149   :  { %v1085_v35 = vrot.slane %v1076_v25, %v1084_v16  ;;  %v1078_v10 = vcombine.high %v1076_v25, %v1076_v25 }
 0x14b   :  { %v1093_v44 = vcombine.high %v1085_v35, %v1085_v35  ;;  %v1092_v23 = vrot.slane %v1078_v10, %v1084_v16  ;;  %v1099_v45 = vpack.c.bf16 %v1085_v35, %v1085_v35 }
 0x14d   :  { %v1100_v38 = vpack.c.bf16 %v1093_v44, %v1093_v44  ;;  %v1094_v21 = vcombine.high %v1092_v23, %v1092_v23  ;;  %v1101_v46 = vpack.c.bf16 %v1092_v23, %v1092_v23 }
 0x14f   :  { %1398 = vmatprep.mubr.bf16.mxu0 %v1100_v38  ;;  %v1102_v22 = vpack.c.bf16 %v1094_v21, %v1094_v21 }
 0x150   :  { %1399 = vmatmul.mubr.bf16.vlgmr.msra.gmra.mxu0 %v1099_v45 }
 0x151   :  { %1438 = vmatprep.mubr.bf16.mxu1 %v1102_v22 }
 0x152   :  { %1439 = vmatmul.mubr.bf16.vlgmr.msra.gmra.mxu1 %v1101_v46 }
 0x210   :  { %v1625_v5 = vpop.f32.mrf.mxu0 }
 0x212   :  { %v1626_v47 = vpop.f32.mrf.mxu0  ;;  %v1647_v27 = vpop.f32.mrf.mxu1 }
 0x213   :  { %v1627_v30 = vadd.f32 %v1626_v47, %v1625_v5 }
 0x214   :  { %v1628_v39 = vpop.f32.mrf.mxu0  ;;  %v1648_v2 = vpop.f32.mrf.mxu1 }
 0x215   :  { %v1401_v59 = vadd.f32 %v1627_v30, %v1576_v24  ;;  %v1649_v52 = vadd.f32 %v1648_v2, %v1647_v27 }
 0x216   :  { %v1629_v60 = vpop.f32.mrf.mxu0  ;;  %v1650_v42 = vpop.f32.mrf.mxu1 }
 0x217   :  { %v1441_v61 = vadd.f32 %v1649_v52, %v1401_v59 }
 0x218   :  { %v1651_v62 = vpop.f32.mrf.mxu1 }
 0x219   :  { %1446 = vst [vmem:[%s2301_s5] sm:$0x3] %v1441_v61 }

</bundles_post_ra>
